<compile_context>
chip_gen: v7x
topology: tpu7x:2x2x1
jax: 0.10.0
libtpu: 0.0.40
codegen_flags: <defaults>
</compile_context>

<pallas_src>
import functools

import jax
import jax.numpy as jnp
from jax import lax
from jax.experimental import pallas as pl
from jax.experimental.pallas import tpu as pltpu

_LANE = 128


def _round_up(n, m):
    return ((n + m - 1) // m) * m


def _mlp_softmax_kernel(x_ref,
                        w1_ref, b1_ref,
                        w2_ref, b2_ref,
                        w3_ref, b3_ref,
                        w4_ref, b4_ref,
                        o_ref):
    """x_ref: (tile_b, state_dim) f32. w*: (out, in) in compute dtype, b*: (out, 1) f32.
    o_ref: (tile_b, action_dim) f32 softmax probabilities."""
    cdt = w1_ref.dtype            # bf16 (default) or f32
    f32 = jnp.float32

    def layer(w_ref, b_ref, a):
        # (out, in) @ (in, tile_b) -> (out, tile_b); f32 accumulation on the MXU.
        return jnp.dot(w_ref[...], a.astype(cdt), preferred_element_type=f32) + b_ref[...]

    # Layer 1 contracts the feature axis of both operands (trans-B matmul), so the batch
    # axis moves onto lanes without any explicit transpose of x.
    h = lax.dot_general(
        w1_ref[...], x_ref[...].astype(cdt),
        dimension_numbers=(((1,), (1,)), ((), ())),
        preferred_element_type=f32) + b1_ref[...]            # (64, tile_b)
    h = jnp.maximum(h, 0.0)
    h = jnp.maximum(layer(w2_ref, b2_ref, h), 0.0)           # (32, tile_b)
    h = jnp.maximum(layer(w3_ref, b3_ref, h), 0.0)           # (8,  tile_b)
    logits = layer(w4_ref, b4_ref, h)                        # (8,  tile_b); pad rows biased -1e30

    # Numerically stable softmax over the (sublane) action axis; padded rows -> exactly 0.
    m = jnp.max(logits, axis=0, keepdims=True)
    e = jnp.exp(logits - m)
    probs = e / jnp.sum(e, axis=0, keepdims=True)            # (8, tile_b), f32

    # Put batch back on sublanes for the natural (batch, action) output layout. tile_b is a
    # multiple of 128, so this is an aligned transpose on the otherwise-idle XLU.
    probs_t = jnp.transpose(probs)                           # (tile_b, 8)
    o_ref[...] = probs_t[:, :o_ref.shape[1]].astype(o_ref.dtype)


def model_forward(x, params, *, tile_b=2048, single_tile_max=8192, use_bf16_matmul=True):
    """x: (batch, state_dim) f32  ->  softmax probs (batch, action_dim) f32."""
    (w1, b1), (w2, b2), (w3, b3), (w4, b4) = params
    batch, state_dim = x.shape
    action_dim = w4.shape[0]

    # Pad fc4 to a sublane-full number of output rows; padded rows get a very negative bias
    # so their softmax probability is exactly zero.
    out_rows = _round_up(action_dim, 8)
    if out_rows != action_dim:
        w4 = jnp.pad(w4, ((0, out_rows - action_dim), (0, 0)))
        b4 = jnp.pad(b4, ((0, out_rows - action_dim), (0, 0)), constant_values=-1e30)

    # Pre-cast weights once (bf16-native MXUs); biases stay f32 (added to f32 accumulator).
    cdt = jnp.bfloat16 if use_bf16_matmul else jnp.float32
    w1, w2, w3, w4 = (w1.astype(cdt), w2.astype(cdt), w3.astype(cdt), w4.astype(cdt))

    # Batch tiling: one big tile for small/moderate batches, else lane-aligned tile_b tiles.
    pb = _round_up(batch, _LANE)
    if pb <= single_tile_max:
        tile = padded = pb
    else:
        tile = _round_up(tile_b, _LANE)
        padded = _round_up(batch, tile)

    if padded != batch:
        x = jnp.pad(x, ((0, padded - batch), (0, 0)))

    grid = (padded // tile,)

    def resident(a):
        # Same full-array block every grid step -> stays VMEM-resident across the batch grid.
        return pl.BlockSpec(a.shape, lambda i: (0, 0))

    # Raise the scoped-VMEM limit only when a very large tile is requested.
    per_row_bytes = 4 * (2 * state_dim + 64 + 32 + 8 + 2 * out_rows + 2 * action_dim)
    est_vmem = per_row_bytes * tile + (1 << 20)
    vmem_limit = int(min(2 * est_vmem, 96 << 20)) if est_vmem > (12 << 20) else None

    out = pl.pallas_call(
        _mlp_softmax_kernel,
        out_shape=jax.ShapeDtypeStruct((padded, action_dim), jnp.float32),
        grid=grid,
        in_specs=[
            pl.BlockSpec((tile, state_dim), lambda i: (i, 0)),   # activations: tiled over batch
            resident(w1), resident(b1),
            resident(w2), resident(b2),
            resident(w3), resident(b3),
            resident(w4), resident(b4),
        ],
        out_specs=pl.BlockSpec((tile, action_dim), lambda i: (i, 0)),
        compiler_params=pltpu.CompilerParams(
            # Batch tiles are independent -> shardable across TensorCores (v7x megacore).
            dimension_semantics=(pltpu.PARALLEL,),
            vmem_limit_bytes=vmem_limit,
        ),
    )(x, w1, b1, w2, b2, w3, b3, w4, b4)

    return out[:batch] if padded != batch else out


def init_linear(key, in_features, out_features):
    # PyTorch nn.Linear-style init: U(-1/sqrt(fan_in), 1/sqrt(fan_in)).
    # Stored in PyTorch layout: W (out, in), b (out, 1).
    kw, kb = jax.random.split(key)
    bound = 1.0 / jnp.sqrt(jnp.float32(in_features))
    w = jax.random.uniform(kw, (out_features, in_features), jnp.float32, -bound, bound)
    b = jax.random.uniform(kb, (out_features, 1), jnp.float32, -bound, bound)
    return w, b


def reference_forward(x, params):
    (w1, b1), (w2, b2), (w3, b3), (w4, b4) = params
    hp = jax.lax.Precision.HIGHEST
    h = jax.nn.relu(jnp.matmul(x, w1.T, precision=hp) + b1.T)
    h = jax.nn.relu(jnp.matmul(h, w2.T, precision=hp) + b2.T)
    h = jax.nn.relu(jnp.matmul(h, w3.T, precision=hp) + b3.T)
    logits = jnp.matmul(h, w4.T, precision=hp) + b4.T
    return jax.nn.softmax(logits, axis=-1)


if __name__ == "__main__":
    state_dim = 16
    action_dim = 4
    batch = 2

    key = jax.random.PRNGKey(0)
    k_in, k_in2, k1, k2, k3, k4 = jax.random.split(key, 6)

    params = (
        init_linear(k1, state_dim, 64),
        init_linear(k2, 64, 32),
        init_linear(k3, 32, 8),
        init_linear(k4, 8, action_dim),
    )

    fwd_bf16 = jax.jit(functools.partial(model_forward, use_bf16_matmul=True))
    fwd_f32 = jax.jit(functools.partial(model_forward, use_bf16_matmul=False))

    x = jax.random.normal(k_in, (batch, state_dim), jnp.float32)
    ref = reference_forward(x, params)

    # Default (bf16 MXU inputs, f32 accumulation) path.
    out = jax.block_until_ready(fwd_bf16(x, params))
    assert out.shape == (batch, action_dim)
    assert jnp.allclose(out, ref, atol=2e-2, rtol=2e-2), float(jnp.max(jnp.abs(out - ref)))
    assert jnp.allclose(jnp.sum(out, axis=-1), 1.0, atol=1e-5)

    # f32 matmul path (tighter tolerance).
    out32 = jax.block_until_ready(fwd_f32(x, params))
    assert jnp.allclose(out32, ref, atol=5e-3, rtol=5e-3), float(jnp.max(jnp.abs(out32 - ref)))

    # Non-multiple-of-lane batch exercises the pad + row-slice path.
    x2 = jax.random.normal(k_in2, (37, state_dim), jnp.float32)
    ref2 = reference_forward(x2, params)
    out2 = jax.block_until_ready(fwd_bf16(x2, params))
    assert out2.shape == (37, action_dim)
    assert jnp.allclose(out2, ref2, atol=2e-2, rtol=2e-2)

    print("KERNEL_OK")
</pallas_src>

<mosaic_0001>
module attributes {stable_mosaic.version = 11 : i64} {
  func.func @_mlp_softmax_kernel(%arg0: i32, %arg1: memref<128x16xf32, #tpu.memory_space<vmem>>, %arg2: memref<64x16xbf16, #tpu.memory_space<vmem>>, %arg3: memref<64x1xf32, #tpu.memory_space<vmem>>, %arg4: memref<32x64xbf16, #tpu.memory_space<vmem>>, %arg5: memref<32x1xf32, #tpu.memory_space<vmem>>, %arg6: memref<8x32xbf16, #tpu.memory_space<vmem>>, %arg7: memref<8x1xf32, #tpu.memory_space<vmem>>, %arg8: memref<8x8xbf16, #tpu.memory_space<vmem>>, %arg9: memref<8x1xf32, #tpu.memory_space<vmem>>, %arg10: memref<128x4xf32, #tpu.memory_space<vmem>>) attributes {dimension_semantics = [#tpu.dimension_semantics<parallel>], iteration_bounds = array<i64: 1>, scalar_prefetch = 0 : i64, scratch_operands = 0 : i64, tpu.core_type = #tpu.core_type<tc>, window_params = [{transform_indices = @transform_0, window_bounds = array<i64: 128, 16>}, {pipeline_mode = #tpu.pipeline_mode<synchronous>, transform_indices = @transform_1, window_bounds = array<i64: 64, 16>}, {pipeline_mode = #tpu.pipeline_mode<synchronous>, transform_indices = @transform_2, window_bounds = array<i64: 64, 1>}, {pipeline_mode = #tpu.pipeline_mode<synchronous>, transform_indices = @transform_3, window_bounds = array<i64: 32, 64>}, {pipeline_mode = #tpu.pipeline_mode<synchronous>, transform_indices = @transform_4, window_bounds = array<i64: 32, 1>}, {pipeline_mode = #tpu.pipeline_mode<synchronous>, transform_indices = @transform_5, window_bounds = array<i64: 8, 32>}, {pipeline_mode = #tpu.pipeline_mode<synchronous>, transform_indices = @transform_6, window_bounds = array<i64: 8, 1>}, {pipeline_mode = #tpu.pipeline_mode<synchronous>, transform_indices = @transform_7, window_bounds = array<i64: 8, 8>}, {pipeline_mode = #tpu.pipeline_mode<synchronous>, transform_indices = @transform_8, window_bounds = array<i64: 8, 1>}, {transform_indices = @transform_9, window_bounds = array<i64: 128, 4>}]} {
    %c0 = arith.constant 0 : index
    %c0_0 = arith.constant 0 : index
    %0 = vector.load %arg2[%c0, %c0_0] : memref<64x16xbf16, #tpu.memory_space<vmem>>, vector<64x16xbf16>
    %c0_1 = arith.constant 0 : index
    %c0_2 = arith.constant 0 : index
    %1 = vector.load %arg1[%c0_1, %c0_2] : memref<128x16xf32, #tpu.memory_space<vmem>>, vector<128x16xf32>
    %2 = arith.truncf %1 : vector<128x16xf32> to vector<128x16xbf16>
    %cst = arith.constant dense<0.000000e+00> : vector<64x128xf32>
    %3 = tpu.matmul %0, %2, %cst {dimension_numbers = #tpu.dot_dimension_numbers<[1], [1], [0], [0], [0, 0, 1, 0], [], []>} : vector<64x16xbf16>, vector<128x16xbf16>, vector<64x128xf32> -> vector<64x128xf32>
    %c0_3 = arith.constant 0 : index
    %c0_4 = arith.constant 0 : index
    %4 = vector.load %arg3[%c0_3, %c0_4] : memref<64x1xf32, #tpu.memory_space<vmem>>, vector<64x1xf32>
    %5 = vector.broadcast %4 : vector<64x1xf32> to vector<64x128xf32>
    %6 = arith.addf %3, %5 : vector<64x128xf32>
    %cst_5 = arith.constant 0.000000e+00 : f32
    %7 = vector.broadcast %cst_5 : f32 to vector<64x128xf32>
    %8 = arith.maximumf %6, %7 : vector<64x128xf32>
    %c0_6 = arith.constant 0 : index
    %c0_7 = arith.constant 0 : index
    %9 = vector.load %arg4[%c0_6, %c0_7] : memref<32x64xbf16, #tpu.memory_space<vmem>>, vector<32x64xbf16>
    %10 = arith.truncf %8 : vector<64x128xf32> to vector<64x128xbf16>
    %cst_8 = arith.constant dense<0.000000e+00> : vector<32x128xf32>
    %11 = tpu.matmul %9, %10, %cst_8 {dimension_numbers = #tpu.dot_dimension_numbers<[1], [0], [0], [1], [0, 0, 1, 1], [], []>} : vector<32x64xbf16>, vector<64x128xbf16>, vector<32x128xf32> -> vector<32x128xf32>
    %c0_9 = arith.constant 0 : index
    %c0_10 = arith.constant 0 : index
    %12 = vector.load %arg5[%c0_9, %c0_10] : memref<32x1xf32, #tpu.memory_space<vmem>>, vector<32x1xf32>
    %13 = vector.broadcast %12 : vector<32x1xf32> to vector<32x128xf32>
    %14 = arith.addf %11, %13 : vector<32x128xf32>
    %cst_11 = arith.constant 0.000000e+00 : f32
    %15 = vector.broadcast %cst_11 : f32 to vector<32x128xf32>
    %16 = arith.maximumf %14, %15 : vector<32x128xf32>
    %c0_12 = arith.constant 0 : index
    %c0_13 = arith.constant 0 : index
    %17 = vector.load %arg6[%c0_12, %c0_13] : memref<8x32xbf16, #tpu.memory_space<vmem>>, vector<8x32xbf16>
    %18 = arith.truncf %16 : vector<32x128xf32> to vector<32x128xbf16>
    %cst_14 = arith.constant dense<0.000000e+00> : vector<8x128xf32>
    %19 = tpu.matmul %17, %18, %cst_14 {dimension_numbers = #tpu.dot_dimension_numbers<[1], [0], [0], [1], [0, 0, 1, 1], [], []>} : vector<8x32xbf16>, vector<32x128xbf16>, vector<8x128xf32> -> vector<8x128xf32>
    %c0_15 = arith.constant 0 : index
    %c0_16 = arith.constant 0 : index
    %20 = vector.load %arg7[%c0_15, %c0_16] : memref<8x1xf32, #tpu.memory_space<vmem>>, vector<8x1xf32>
    %21 = vector.broadcast %20 : vector<8x1xf32> to vector<8x128xf32>
    %22 = arith.addf %19, %21 : vector<8x128xf32>
    %cst_17 = arith.constant 0.000000e+00 : f32
    %23 = vector.broadcast %cst_17 : f32 to vector<8x128xf32>
    %24 = arith.maximumf %22, %23 : vector<8x128xf32>
    %c0_18 = arith.constant 0 : index
    %c0_19 = arith.constant 0 : index
    %25 = vector.load %arg8[%c0_18, %c0_19] : memref<8x8xbf16, #tpu.memory_space<vmem>>, vector<8x8xbf16>
    %26 = arith.truncf %24 : vector<8x128xf32> to vector<8x128xbf16>
    %cst_20 = arith.constant dense<0.000000e+00> : vector<8x128xf32>
    %27 = tpu.matmul %25, %26, %cst_20 {dimension_numbers = #tpu.dot_dimension_numbers<[1], [0], [0], [1], [0, 0, 1, 1], [], []>} : vector<8x8xbf16>, vector<8x128xbf16>, vector<8x128xf32> -> vector<8x128xf32>
    %c0_21 = arith.constant 0 : index
    %c0_22 = arith.constant 0 : index
    %28 = vector.load %arg9[%c0_21, %c0_22] : memref<8x1xf32, #tpu.memory_space<vmem>>, vector<8x1xf32>
    %29 = vector.broadcast %28 : vector<8x1xf32> to vector<8x128xf32>
    %30 = arith.addf %27, %29 : vector<8x128xf32>
    %cst_23 = arith.constant dense<0xFF800000> : vector<128xf32>
    %31 = vector.multi_reduction <maximumf>, %30, %cst_23 [0] : vector<8x128xf32> to vector<128xf32>
    %32 = vector.shape_cast %31 : vector<128xf32> to vector<1x128xf32>
    %33 = vector.broadcast %32 : vector<1x128xf32> to vector<8x128xf32>
    %34 = arith.subf %30, %33 : vector<8x128xf32>
    %35 = math.exp %34 : vector<8x128xf32>
    %cst_24 = arith.constant dense<0.000000e+00> : vector<128xf32>
    %36 = vector.multi_reduction <add>, %35, %cst_24 [0] : vector<8x128xf32> to vector<128xf32>
    %37 = vector.shape_cast %36 : vector<128xf32> to vector<1x128xf32>
    %38 = vector.broadcast %37 : vector<1x128xf32> to vector<8x128xf32>
    %39 = arith.divf %35, %38 : vector<8x128xf32>
    %40 = tpu.transpose %39, [1, 0] : vector<8x128xf32> -> vector<128x8xf32>
    %41 = vector.extract_strided_slice %40 {offsets = [0, 0], sizes = [128, 4], strides = [1, 1]} : vector<128x8xf32> to vector<128x4xf32>
    %c0_25 = arith.constant 0 : index
    %c0_26 = arith.constant 0 : index
    %42 = vector.load %arg10[%c0_25, %c0_26] : memref<128x4xf32, #tpu.memory_space<vmem>>, vector<128x4xf32>
    tpu.vector_store %arg10[%c0_25, %c0_26], %41 {strides = array<i32>} : memref<128x4xf32, #tpu.memory_space<vmem>>, vector<128x4xf32>,
    return
  }
  func.func @transform_0(%arg0: i32) -> (i32, i32) {
    %c0_i32 = arith.constant 0 : i32
    %c0_i32_0 = arith.constant 0 : i32
    return %arg0, %c0_i32 : i32, i32
  }
  func.func @transform_1(%arg0: i32) -> (i32, i32) {
    %c0_i32 = arith.constant 0 : i32
    %c0_i32_0 = arith.constant 0 : i32
    %c0_i32_1 = arith.constant 0 : i32
    return %c0_i32, %c0_i32_0 : i32, i32
  }
  func.func @transform_2(%arg0: i32) -> (i32, i32) {
    %c0_i32 = arith.constant 0 : i32
    %c0_i32_0 = arith.constant 0 : i32
    %c0_i32_1 = arith.constant 0 : i32
    return %c0_i32, %c0_i32_0 : i32, i32
  }
  func.func @transform_3(%arg0: i32) -> (i32, i32) {
    %c0_i32 = arith.constant 0 : i32
    %c0_i32_0 = arith.constant 0 : i32
    %c0_i32_1 = arith.constant 0 : i32
    return %c0_i32, %c0_i32_0 : i32, i32
  }
  func.func @transform_4(%arg0: i32) -> (i32, i32) {
    %c0_i32 = arith.constant 0 : i32
    %c0_i32_0 = arith.constant 0 : i32
    %c0_i32_1 = arith.constant 0 : i32
    return %c0_i32, %c0_i32_0 : i32, i32
  }
  func.func @transform_5(%arg0: i32) -> (i32, i32) {
    %c0_i32 = arith.constant 0 : i32
    %c0_i32_0 = arith.constant 0 : i32
    %c0_i32_1 = arith.constant 0 : i32
    return %c0_i32, %c0_i32_0 : i32, i32
  }
  func.func @transform_6(%arg0: i32) -> (i32, i32) {
    %c0_i32 = arith.constant 0 : i32
    %c0_i32_0 = arith.constant 0 : i32
    %c0_i32_1 = arith.constant 0 : i32
    return %c0_i32, %c0_i32_0 : i32, i32
  }
  func.func @transform_7(%arg0: i32) -> (i32, i32) {
    %c0_i32 = arith.constant 0 : i32
    %c0_i32_0 = arith.constant 0 : i32
    %c0_i32_1 = arith.constant 0 : i32
    return %c0_i32, %c0_i32_0 : i32, i32
  }
  func.func @transform_8(%arg0: i32) -> (i32, i32) {
    %c0_i32 = arith.constant 0 : i32
    %c0_i32_0 = arith.constant 0 : i32
    %c0_i32_1 = arith.constant 0 : i32
    return %c0_i32, %c0_i32_0 : i32, i32
  }
  func.func @transform_9(%arg0: i32) -> (i32, i32) {
    %c0_i32 = arith.constant 0 : i32
    %c0_i32_0 = arith.constant 0 : i32
    return %arg0, %c0_i32 : i32, i32
  }
}

</mosaic_0001>

<bundles_post_ra>
// kernel: model_forward.1
= control target key start
LH: loop header
LB: loop body
LE: loop exit
PB: predicated region body
PF: predicated region fallthrough
CT: control target
= control target key end

     0   :  { %vm133_vm0 = vcmask 130048   ;;  %v635_v3 = vmov 0   ;;  %vm285_vm1 = vcmask 523264   ;;  %vm637_vm2 = vmmov 0   ;;  %s890_s0 = inlined_call_operand.vmem [shape: f32[128,16], index: 0, kind: input, shape index: {}]   ;;  %s891_s1 = inlined_call_operand.vmem [shape: bf16[64,16], index: 1, kind: input, shape index: {}]   ;;  %s892_s2 = inlined_call_operand.vmem [shape: f32[64,1], index: 2, kind: input, shape index: {}]   ;;  %s893_s4 = inlined_call_operand.vmem [shape: f32[32,1], index: 4, kind: input, shape index: {}]   ;;  %s894_s6 = inlined_call_operand.vmem [shape: f32[8,1], index: 6, kind: input, shape index: {}]   ;;  %s895_s8 = inlined_call_operand.vmem [shape: f32[8,1], index: 8, kind: input, shape index: {}]   ;;  %s896_s3 = inlined_call_operand.vmem [shape: bf16[32,64], index: 3, kind: input, shape index: {}]   ;;  %s897_s5 = inlined_call_operand.vmem [shape: bf16[8,32], index: 5, kind: input, shape index: {}]   ;;  %s898_s7 = inlined_call_operand.vmem [shape: bf16[8,8], index: 7, kind: input, shape index: {}]   ;;  %s899_s9 = inlined_call_operand.vmem [shape: f32[128,4], index: 9, kind: output, shape index: {}]  }
   0x1   :  { %v41_v0 = vld [vmem:[%s890_s0] sm:$0xff]  ;;  %v42_v1 = vld [vmem:[%s890_s0 + $0x8] sm:$0xff]  ;;  %v43_v2 = vld [vmem:[%s890_s0 + $0x10] sm:$0xff]  ;;  %623 = vset.pattern.permute.xlu0 %v635_v3  ;;  %624 = vset.pattern.permute.xlu1 %v635_v3  ;;  %vm354_vm3 = vcmask 261120   ;;  %vm411_vm4 = vcmask 1043456   ;;  %vm407_vm5 = vcmask 64512  }
   0x2   :  { %v57_v4 = vpack.c.bf16 %v42_v1, %v41_v0  ;;  %v44_v5 = vld [vmem:[%s890_s0 + $0x18] sm:$0xff]  ;;  %v45_v8 = vld [vmem:[%s890_s0 + $0x20] sm:$0xff]  ;;  %v46_v9 = vld [vmem:[%s890_s0 + $0x28] sm:$0xff]  ;;  %vm504_vm6 = vcmask 31744  }
   0x3   :  { %v58_v6 = vpack.c.bf16 %v44_v5, %v43_v2  ;;  %v625_v10 = vld [vmem:[%s891_s1] sm:$0xff]   ;;  %v59_v12 = vpack.c.bf16 %v46_v9, %v45_v8  ;;  %v67_v14 = vld [vmem:[%s892_s2 + $0x10] sm:$0xff]  ;;  %v66_v15 = vld [vmem:[%s892_s2 + $0x8] sm:$0xff] }
   0x4   :  { %612 = vmatprep.subr.msk.bf16.mxu0 %vm133_vm0, %v57_v4  ;;  %v147_v7 = vsel %vm133_vm0, %v57_v4, 0  ;;  %578 = vmatprep.mubr.msk.bf16.mxu0 %vm133_vm0, %v625_v10  ;;  %v65_v13 = vld [vmem:[%s892_s2] sm:$0xff]  ;;  %v68_v16 = vld [vmem:[%s892_s2 + $0x18] sm:$0xff]  ;;  %v47_v17 = vld [vmem:[%s890_s0 + $0x30] sm:$0xff] }
   0x5   :  { %563 = vmatpush3.bf16.xpose.msra.mxu0 %v147_v7  ;;  %v150_v11 = vsel %vm133_vm0, %v58_v6, 0  ;;  %75 = vperm.xlu0 %623, %v65_v13   ;;  %v48_v18 = vld [vmem:[%s890_s0 + $0x38] sm:$0xff]  ;;  %v69_v19 = vld [vmem:[%s892_s2 + $0x20] sm:$0xff]  ;;  %v70_v20 = vld [vmem:[%s892_s2 + $0x28] sm:$0xff]  ;;  %v153_v21 = vsel %vm133_vm0, %v59_v12, 0 }
   0x6   :  { %613 = vmatprep.subr.msk.bf16.mxu0 %vm133_vm0, %v58_v6  ;;  %85 = vperm.xlu1 %624, %v67_v14   ;;  %v60_v22 = vpack.c.bf16 %v48_v18, %v47_v17  ;;  %v71_v23 = vld [vmem:[%s892_s2 + $0x30] sm:$0xff]  ;;  %v72_v24 = vld [vmem:[%s892_s2 + $0x38] sm:$0xff]  ;;  %v49_v25 = vld [vmem:[%s890_s0 + $0x40] sm:$0xff] }
   0x7   :  { %v50_v26 = vld [vmem:[%s890_s0 + $0x48] sm:$0xff]  ;;  %v251_v27 = vld [vmem:[%s893_s4] sm:$0xff]  ;;  %v253_v31 = vld [vmem:[%s893_s4 + $0x10] sm:$0xff] }
   0x8   :  { %v252_v28 = vld [vmem:[%s893_s4 + $0x8] sm:$0xff]  ;;  %v156_v29 = vsel %vm133_vm0, %v60_v22, 0  ;;  %v61_v30 = vpack.c.bf16 %v50_v26, %v49_v25  ;;  %v254_v32 = vld [vmem:[%s893_s4 + $0x18] sm:$0xff]  ;;  %v51_v33 = vld [vmem:[%s890_s0 + $0x50] sm:$0xff]  ;;  %v636_v25 = vmov 0.0  }
   0x9   :  { %80 = vperm.xlu0 %623, %v66_v15   ;;  %v52_v34 = vld [vmem:[%s890_s0 + $0x58] sm:$0xff]  ;;  %v348_v35 = vld [vmem:[%s894_s6] sm:$0xff]  ;;  %v54_v40 = vld [vmem:[%s890_s0 + $0x68] sm:$0xff] }
   0xa   :  { %90 = vperm.xlu1 %624, %v68_v16   ;;  %v401_v36 = vld [vmem:[%s895_s8] sm:$0xff]  ;;  %v159_v37 = vsel %vm133_vm0, %v61_v30, 0  ;;  %v62_v38 = vpack.c.bf16 %v52_v34, %v51_v33  ;;  %v55_v43 = vld [vmem:[%s890_s0 + $0x70] sm:$0xff]  ;;  %v56_v44 = vld [vmem:[%s890_s0 + $0x78] sm:$0xff] }
   0xb   :  { %v53_v39 = vld [vmem:[%s890_s0 + $0x60] sm:$0xff]  ;;  %v64_v46 = vpack.c.bf16 %v56_v44, %v55_v43  ;;  %v626_v48 = vld [vmem:[%s891_s1 + $0x8] sm:$0xff]   ;;  %v627_v49 = vld [vmem:[%s891_s1 + $0x10] sm:$0xff]  }
   0xc   :  { %v162_v41 = vsel %vm133_vm0, %v62_v38, 0  ;;  %v63_v42 = vpack.c.bf16 %v54_v40, %v53_v39  ;;  %v628_v50 = vld [vmem:[%s891_s1 + $0x18] sm:$0xff]   ;;  %v629_v51 = vld [vmem:[%s896_s3] sm:$0xff]  }
   0xd   :  { %565 = vmatpush3.bf16.xpose.msra.mxu0 %v150_v11  ;;  %95 = vperm.xlu0 %623, %v69_v19   ;;  %v168_v47 = vsel %vm133_vm0, %v64_v46, 0  ;;  %v345_v44 = vld [vmem:[%s897_s5] sm:$0xf] }
   0xe   :  { %614 = vmatprep.subr.msk.bf16.mxu0 %vm133_vm0, %v59_v12  ;;  %100 = vperm.xlu1 %624, %v70_v20   ;;  %v165_v45 = vsel %vm133_vm0, %v63_v42, 0 }
   0xf   :  { %594 = vmatprep.mubr.msk.bf16.mxu1 %vm285_vm1, %v629_v51 }
  0x11   :  { %105 = vperm.xlu0 %623, %v71_v23  }
  0x12   :  { %110 = vperm.xlu1 %624, %v72_v24   ;;  %v630_v24 = vld [vmem:[%s896_s3 + $0x8] sm:$0xff]  }
  0x15   :  { %567 = vmatpush3.bf16.xpose.msra.mxu0 %v153_v21  ;;  %257 = vperm.xlu0 %623, %v251_v27  }
  0x16   :  { %615 = vmatprep.subr.msk.bf16.mxu0 %vm133_vm0, %v60_v22  ;;  %262 = vperm.xlu1 %624, %v252_v28  }
  0x19   :  { %267 = vperm.xlu0 %623, %v253_v31  }
  0x1a   :  { %272 = vperm.xlu1 %624, %v254_v32  }
  0x1d   :  { %569 = vmatpush3.bf16.xpose.msra.mxu0 %v156_v29  ;;  %351 = vperm.xlu0 %623, %v348_v35  }
  0x1e   :  { %616 = vmatprep.subr.msk.bf16.mxu0 %vm133_vm0, %v61_v30  ;;  %404 = vperm.xlu1 %624, %v401_v36  }
  0x25   :  { %571 = vmatpush3.bf16.xpose.msra.mxu0 %v159_v37 }
  0x26   :  { %617 = vmatprep.subr.msk.bf16.mxu0 %vm133_vm0, %v62_v38 }
  0x2d   :  { %573 = vmatpush3.bf16.xpose.msra.mxu0 %v162_v41 }
  0x2e   :  { %618 = vmatprep.subr.msk.bf16.mxu0 %vm133_vm0, %v63_v42 }
  0x35   :  { %575 = vmatpush3.bf16.xpose.msra.mxu0 %v165_v45 }
  0x36   :  { %619 = vmatprep.subr.msk.bf16.mxu0 %vm133_vm0, %v64_v46 }
  0x3d   :  { %577 = vmatpush3.bf16.xpose.msra.mxu0 %v168_v47 }
  0x44   :  { %579 = vmatmul.mubr.msk.bf16.vlgmr.msra.gmra.mrb[0].mxu0 %vm133_vm0, %v626_v48 }
  0x45   :  { %582 = vmatprep.mubr.msk.bf16.mxu0 %vm133_vm0, %v627_v49 }
  0x4c   :  { %583 = vmatmul.mubr.msk.bf16.gmra.mrb[4].mxu0 %vm133_vm0, %v628_v50 }
  0x84   :  { %v76_v52 = vpop.permute.xlu0 %75 }
  0x85   :  { %v86_v53 = vpop.permute.xlu1 %85 }
  0x88   :  { %v81_v54 = vpop.permute.xlu0 %80 }
  0x89   :  { %v91_v55 = vpop.permute.xlu1 %90 }
  0x8c   :  { %v96_v59 = vpop.permute.xlu0 %95 }
  0x8d   :  { %v101_v0 = vpop.permute.xlu1 %100 }
  0x90   :  { %v106_v7 = vpop.permute.xlu0 %105 }
  0x91   :  { %v111_v12 = vpop.permute.xlu1 %110 }
  0x94   :  { %v258_v26 = vpop.permute.xlu0 %257 }
  0x95   :  { %v263_v27 = vpop.permute.xlu1 %262 }
  0x98   :  { %v268_v28 = vpop.permute.xlu0 %267 }
  0x99   :  { %v273_v32 = vpop.permute.xlu1 %272 }
  0x9c   :  { %v352_v45 = vpop.permute.xlu0 %351 }
 0x117   :  { %v580_v56 = vpop.f32.mrb[0].mxu0 }
 0x118   :  { %v213_v57 = vadd.f32 %v580_v56, %v86_v53  ;;  %v204_v58 = vpop.f32.mrb[1].mxu0 }
 0x119   :  { %v205_v60 = vadd.f32 %v204_v58, %v76_v52  ;;  %v581_v61 = vpop.f32.mrb[2].mxu0 }
 0x11a   :  { %v216_v62 = vadd.f32 %v581_v61, %v91_v55  ;;  %v207_v63 = vpop.f32.mrb[3].mxu0  ;;  %v237_v2 = vmax.f32 %v213_v57, 0.0  ;;  %v405_v55 = vpop.permute.xlu1 %404 }
 0x11b   :  { %v208_v1 = vadd.f32 %v207_v63, %v81_v54  ;;  %v235_v4 = vmax.f32 %v205_v60, 0.0  ;;  %v399_v54 = vld [vmem:[%s898_s7] sm:$0xf] }
 0x11c   :  { %v238_v3 = vmax.f32 %v216_v62, 0.0 }
 0x11d   :  { %v236_v5 = vmax.f32 %v208_v1, 0.0 }
 0x11e   :  { %v248_v6 = vpack.c.bf16 %v238_v3, %v237_v2 }
 0x11f   :  { %v584_v8 = vpop.f32.mrb[4].mxu0  ;;  %v247_v9 = vpack.c.bf16 %v236_v5, %v235_v4 }
 0x120   :  { %v229_v10 = vadd.f32 %v584_v8, %v106_v7  ;;  %v220_v11 = vpop.f32.mrb[5].mxu0 }
 0x121   :  { %v221_v13 = vadd.f32 %v220_v11, %v96_v59  ;;  %v585_v14 = vpop.f32.mrb[6].mxu0  ;;  %586 = vmatprep.subr.bf16.mxu1 %v247_v9 }
 0x122   :  { %v232_v15 = vadd.f32 %v585_v14, %v111_v12  ;;  %v223_v16 = vpop.f32.mrb[7].mxu0  ;;  %587 = vmatpush3.bf16.msra.mxu1 %v247_v9  ;;  %v241_v18 = vmax.f32 %v229_v10, 0.0 }
 0x123   :  { %v224_v17 = vadd.f32 %v223_v16, %v101_v0  ;;  %588 = vmatprep.subr.bf16.mxu1 %v248_v6  ;;  %v239_v20 = vmax.f32 %v221_v13, 0.0 }
 0x124   :  { %v242_v19 = vmax.f32 %v232_v15, 0.0 }
 0x125   :  { %v240_v21 = vmax.f32 %v224_v17, 0.0 }
 0x126   :  { %v250_v22 = vpack.c.bf16 %v242_v19, %v241_v18  ;;  %589 = vmatpush3.bf16.msra.mxu1 %v248_v6 }
 0x127   :  { %v249_v23 = vpack.c.bf16 %v240_v21, %v239_v20 }
 0x129   :  { %590 = vmatprep.subr.bf16.mxu1 %v249_v23 }
 0x12a   :  { %591 = vmatpush3.bf16.msra.mxu1 %v249_v23 }
 0x12b   :  { %592 = vmatprep.subr.bf16.mxu1 %v250_v22 }
 0x12e   :  { %593 = vmatpush3.bf16.msra.mxu1 %v250_v22 }
 0x12f   :  { %598 = vmatprep.subr.bf16.mxu1 %v636_v25 }
 0x131   :  { %595 = vmatmul.mubr.msk.bf16.vlgmr.msra.gmra.mrb[0].mxu1 %vm285_vm1, %v630_v24 }
 0x132   :  { %602 = vmatprep.mubr.msk.bf16.mxu1 %vm637_vm2, %v636_v25 }
 0x204   :  { %v596_v29 = vpop.f32.mrb[0].mxu1 }
 0x205   :  { %v335_v30 = vadd.f32 %v596_v29, %v268_v28  ;;  %v326_v31 = vpop.f32.mrb[1].mxu1 }
 0x206   :  { %v327_v33 = vadd.f32 %v326_v31, %v258_v26  ;;  %v597_v34 = vpop.f32.mrb[2].mxu1 }
 0x207   :  { %v338_v35 = vadd.f32 %v597_v34, %v273_v32  ;;  %v329_v36 = vpop.f32.mrb[3].mxu1  ;;  %v343_v38 = vmax.f32 %v335_v30, 0.0 }
 0x208   :  { %v330_v37 = vadd.f32 %v329_v36, %v263_v27  ;;  %v341_v40 = vmax.f32 %v327_v33, 0.0 }
 0x209   :  { %v344_v39 = vmax.f32 %v338_v35, 0.0 }
 0x20a   :  { %v342_v41 = vmax.f32 %v330_v37, 0.0 }
 0x20b   :  { %v347_v42 = vpack.c.bf16 %v344_v39, %v343_v38 }
 0x20c   :  { %v346_v43 = vpack.c.bf16 %v342_v41, %v341_v40 }
 0x20e   :  { %599 = vmatpush3.bf16.msra.mxu1 %v346_v43 }
 0x20f   :  { %600 = vmatprep.subr.bf16.mxu1 %v636_v25 }
 0x212   :  { %601 = vmatpush3.bf16.msra.mxu1 %v347_v42 }
 0x213   :  { %606 = vmatprep.subr.bf16.mxu1 %v636_v25 }
 0x215   :  { %603 = vmatmul.mubr.msk.bf16.vlgmr.msra.gmra.mrb[4].mxu1 %vm354_vm3, %v345_v44 }
 0x216   :  { %608 = vmatprep.mubr.msk.bf16.mxu1 %vm637_vm2, %v636_v25 }
 0x2e8   :  { %v392_v46 = vpop.f32.mrb[4].mxu1 }
 0x2e9   :  { %v393_v47 = vadd.f32 %v392_v46, %v352_v45  ;;  %v604_v48 = vpop.f32.mrb[5].mxu1 }
 0x2ea   :  { %v395_v49 = vpop.f32.mrb[6].mxu1 }
 0x2eb   :  { %v398_v50 = vmax.f32 %v393_v47, 0.0  ;;  %v605_v51 = vpop.f32.mrb[7].mxu1 }
 0x2ed   :  { %v400_v52 = vpack.c.bf16 %v398_v50, %v398_v50 }
 0x2ef   :  { %v413_v53 = vsel %vm411_vm4, %v400_v52, 0 }
 0x2f0   :  { %607 = vmatpush3.bf16.msra.mxu1 %v413_v53 }
 0x2f3   :  { %609 = vmatmul.mubr.msk.bf16.vlgmr.msra.gmra.mrb[8].mxu1 %vm407_vm5, %v399_v54 }
 0x3c6   :  { %v449_v56 = vpop.f32.mrb[8].mxu1 }
 0x3c7   :  { %v450_v57 = vadd.f32 %v449_v56, %v405_v55  ;;  %v610_v58 = vpop.f32.mrb[9].mxu1 }
 0x3c8   :  { %v452_v59 = vpop.f32.mrb[10].mxu1 }
 0x3c9   :  { %v455_v60 = vrot.slane %v450_v57, 4  ;;  %v611_v61 = vpop.f32.mrb[11].mxu1 }
 0x3cb   :  { %v456_v62 = vmax.f32 %v450_v57, %v455_v60 }
 0x3cd   :  { %v457_v63 = vrot.slane %v456_v62, 2 }
 0x3cf   :  { %v458_v0 = vmax.f32 %v456_v62, %v457_v63 }
 0x3d1   :  { %v459_v1 = vrot.slane %v458_v0, 1 }
 0x3d3   :  { %v460_v2 = vmax.f32 %v458_v0, %v459_v1 }
 0x3d5   :  { %v461_v3 = vsub.f32 %v450_v57, %v460_v2 }
 0x3d7   :  { %v462_v4 = vmul.f32 1.442695, %v461_v3 }
 0x3d9   :  { %631 = vpow2.f32 %v462_v4 }
 0x3e3   :  { %v632_v5 = vpop.eup %631 }
 0x3e4   :  { %v464_v6 = vrot.slane %v632_v5, 4 }
 0x3e6   :  { %v465_v7 = vadd.f32 %v632_v5, %v464_v6 }
 0x3e8   :  { %v466_v8 = vrot.slane %v465_v7, 2 }
 0x3ea   :  { %v467_v9 = vadd.f32 %v466_v8, %v465_v7 }
 0x3ec   :  { %v468_v10 = vrot.slane %v467_v9, 1 }
 0x3ee   :  { %v469_v11 = vadd.f32 %v468_v10, %v467_v9 }
 0x3f0   :  { %633 = vrcp.f32 %v469_v11 }
 0x3fa   :  { %v634_v12 = vpop.eup %633 }
 0x3fb   :  { %v471_v13 = vmul.f32 %v634_v12, %v632_v5 }
 0x3fd   :  { %472 = vxpose.xlu0.b32.start.end [1/1] (short) %v471_v13, 128 }
 0x47d   :  { %v488_v14 = vpop.trf.xlu0 }
 0x47e   :  { %505 = vst.msk [vmem:[%s899_s9] sm:$0xff] %vm504_vm6, %v488_v14 }
 0x481   :  { %v489_v15 = vpop.trf.xlu0 }
 0x482   :  { %506 = vst.msk [vmem:[%s899_s9 + $0x8] sm:$0xff] %vm504_vm6, %v489_v15 }
 0x485   :  { %v490_v16 = vpop.trf.xlu0 }
 0x486   :  { %507 = vst.msk [vmem:[%s899_s9 + $0x10] sm:$0xff] %vm504_vm6, %v490_v16 }
 0x489   :  { %v491_v17 = vpop.trf.xlu0 }
 0x48a   :  { %508 = vst.msk [vmem:[%s899_s9 + $0x18] sm:$0xff] %vm504_vm6, %v491_v17 }
 0x48d   :  { %v492_v18 = vpop.trf.xlu0 }
 0x48e   :  { %509 = vst.msk [vmem:[%s899_s9 + $0x20] sm:$0xff] %vm504_vm6, %v492_v18 }
 0x491   :  { %v493_v19 = vpop.trf.xlu0 }
 0x492   :  { %510 = vst.msk [vmem:[%s899_s9 + $0x28] sm:$0xff] %vm504_vm6, %v493_v19 }
 0x495   :  { %v494_v20 = vpop.trf.xlu0 }
 0x496   :  { %511 = vst.msk [vmem:[%s899_s9 + $0x30] sm:$0xff] %vm504_vm6, %v494_v20 }
 0x499   :  { %v495_v21 = vpop.trf.xlu0 }
 0x49a   :  { %512 = vst.msk [vmem:[%s899_s9 + $0x38] sm:$0xff] %vm504_vm6, %v495_v21 }
 0x49d   :  { %v496_v22 = vpop.trf.xlu0 }
 0x49e   :  { %513 = vst.msk [vmem:[%s899_s9 + $0x40] sm:$0xff] %vm504_vm6, %v496_v22 }
 0x4a1   :  { %v497_v23 = vpop.trf.xlu0 }
 0x4a2   :  { %514 = vst.msk [vmem:[%s899_s9 + $0x48] sm:$0xff] %vm504_vm6, %v497_v23 }
 0x4a5   :  { %v498_v24 = vpop.trf.xlu0 }
 0x4a6   :  { %515 = vst.msk [vmem:[%s899_s9 + $0x50] sm:$0xff] %vm504_vm6, %v498_v24 }
 0x4a9   :  { %v499_v25 = vpop.trf.xlu0 }
 0x4aa   :  { %516 = vst.msk [vmem:[%s899_s9 + $0x58] sm:$0xff] %vm504_vm6, %v499_v25 }
 0x4ad   :  { %v500_v26 = vpop.trf.xlu0 }
 0x4ae   :  { %517 = vst.msk [vmem:[%s899_s9 + $0x60] sm:$0xff] %vm504_vm6, %v500_v26 }
 0x4b1   :  { %v501_v27 = vpop.trf.xlu0 }
 0x4b2   :  { %518 = vst.msk [vmem:[%s899_s9 + $0x68] sm:$0xff] %vm504_vm6, %v501_v27 }
 0x4b5   :  { %v502_v28 = vpop.trf.xlu0 }
 0x4b6   :  { %519 = vst.msk [vmem:[%s899_s9 + $0x70] sm:$0xff] %vm504_vm6, %v502_v28 }
 0x4b9   :  { %v503_v29 = vpop.trf.xlu0 }
 0x4ba   :  { %520 = vst.msk [vmem:[%s899_s9 + $0x78] sm:$0xff] %vm504_vm6, %v503_v29 }

</bundles_post_ra>
